<compile_context>
chip_gen: v6e
topology: v6e:2x2x1
jax: 0.10.0
libtpu: 0.0.40
codegen_flags: <defaults>
</compile_context>

<pallas_src>
import functools

import jax
import jax.numpy as jnp
import numpy as np
from jax.experimental import pallas as pl
from jax.experimental.pallas import tpu as pltpu

HIDDEN = 128
BN_EPS = 1e-5
OUT_BIAS_CONST = 3.8638
X_TILE_BYTES = 4 * 1024 * 1024   # target bytes per x tile buffer
MAX_TILE_ROWS = 4096


def _round_up(n, m):
    return ((n + m - 1) // m) * m


def _cdiv(a, b):
    return -(-a // b)


def _choose_tile_rows(B, D, target_rows):
    """Batch-tile rows: balanced across tiles, multiple of 8 (ragged last tile OK)."""
    del D
    target_rows = max(8, min(target_rows, MAX_TILE_ROWS))
    # Keep at least 2 grid steps when B allows, so v7x's two TensorCores both work.
    if B > 16:
        target_rows = min(target_rows, _round_up(_cdiv(B, 2), 8))
    if B <= target_rows:
        return B                      # single tile; block == full array dims (legal)
    num_tiles = _cdiv(B, target_rows)
    return _round_up(_cdiv(B, num_tiles), 8)


def matvec_kernel(x_ref, w_ref, bias_ref, out_ref):
    # x:    (tb, D)  VMEM batch tile
    # w:    (1, D)   lane-dense folded weight (resident across the grid)
    # bias: (1, 1)   folded scalar bias in SMEM
    # out:  (tb, 1)
    # VPU broadcast-multiply + cross-lane reduce (no degenerate N=1 MXU matmul).
    prod = x_ref[...] * w_ref[...]
    out_ref[...] = jnp.sum(prod, axis=-1, keepdims=True) + bias_ref[0, 0]


@functools.partial(jax.jit, static_argnames=("tile_rows",))
def regression_forward(x, w_eff, bias, *, tile_rows=None):
    """x: (B, D) float32.  w_eff: (1, D).  bias: (1, 1).  Returns (B, 1)."""
    B, D = x.shape
    if tile_rows is None:
        tile_rows = max(X_TILE_BYTES // max(D * 4, 1), 8)
    tb = _choose_tile_rows(B, D, tile_rows)
    grid = (pl.cdiv(B, tb),)

    # Explicit scoped-VMEM limit: default is 16 MiB on v5e / 32 MiB on v6e/v7x.
    d_pad = _round_up(D, 128)
    need = 2 * (tb * d_pad * 4        # double-buffered x tiles
                + tb * 128 * 4        # double-buffered (tb, 1) out tiles (lane-padded)
                + 8 * d_pad * 4)      # (1, D) weight buffers (sublane-padded)
    vmem_limit = int(min(max(need + (4 << 20), 16 << 20), 56 << 20))

    return pl.pallas_call(
        matvec_kernel,
        out_shape=jax.ShapeDtypeStruct((B, 1), jnp.float32),
        grid=grid,
        in_specs=[
            pl.BlockSpec((tb, D), lambda i: (i, 0)),              # x batch tiles
            pl.BlockSpec((1, D), lambda i: (0, 0)),               # folded weight
            pl.BlockSpec(memory_space=pltpu.MemorySpace.SMEM),    # scalar bias
        ],
        out_specs=pl.BlockSpec((tb, 1), lambda i: (i, 0)),
        compiler_params=pltpu.CompilerParams(
            dimension_semantics=("parallel",),
            vmem_limit_bytes=vmem_limit),
    )(x, w_eff, bias)


def init_torch_params(key, input_dim):
    """Deterministic synthetic init with the PyTorch module's parameter shapes."""
    ks = jax.random.split(key, 8)
    w1 = jax.random.normal(ks[0], (HIDDEN, input_dim), jnp.float32) * 0.1   # layer1.weight
    b1 = jax.random.normal(ks[1], (HIDDEN,), jnp.float32) * 0.1             # layer1.bias
    gamma = 1.0 + 0.1 * jax.random.normal(ks[2], (HIDDEN,), jnp.float32)    # bn.weight
    beta = 0.1 * jax.random.normal(ks[3], (HIDDEN,), jnp.float32)           # bn.bias
    running_mean = 0.1 * jax.random.normal(ks[4], (HIDDEN,), jnp.float32)
    running_var = 1.0 + 0.1 * jax.random.uniform(ks[5], (HIDDEN,), jnp.float32)
    w2 = jax.random.normal(ks[6], (1, HIDDEN), jnp.float32) * 0.1           # layer2.weight
    b2 = jax.random.normal(ks[7], (1,), jnp.float32) * 0.1                  # layer2.bias
    return dict(w1=w1, b1=b1, gamma=gamma, beta=beta,
                running_mean=running_mean, running_var=running_var,
                w2=w2, b2=b2)


def fold_params(p):
    """Fold Linear -> BN(eval) -> Dropout(eval) -> Linear (+const) into one matvec."""
    scale = p["gamma"] * jax.lax.rsqrt(p["running_var"] + BN_EPS)             # (128,)
    w1_eff = p["w1"] * scale[:, None]                                         # (128, D)
    b1_eff = (p["b1"] - p["running_mean"]) * scale + p["beta"]                # (128,)
    w_eff = jnp.dot(p["w2"], w1_eff, precision=jax.lax.Precision.HIGHEST)     # (1, D) lane-dense
    bias = (jnp.dot(p["w2"], b1_eff[:, None],
                    precision=jax.lax.Precision.HIGHEST)
            + p["b2"][:, None] + OUT_BIAS_CONST)                              # (1, 1)
    return w_eff.astype(jnp.float32), bias.astype(jnp.float32)


def reference_forward(x, p):
    """Pure-JAX, unfolded eval-mode reference."""
    h = jnp.dot(x, p["w1"].T, precision=jax.lax.Precision.HIGHEST) + p["b1"]
    h = (h - p["running_mean"]) / jnp.sqrt(p["running_var"] + BN_EPS)
    h = h * p["gamma"] + p["beta"]
    # dropout: identity in eval mode
    return (jnp.dot(h, p["w2"].T, precision=jax.lax.Precision.HIGHEST)
            + p["b2"] + OUT_BIAS_CONST)


if __name__ == "__main__":
    B, INPUT_DIM = 8, 32
    key = jax.random.PRNGKey(0)
    kx, kp, kx2 = jax.random.split(key, 3)

    torch_params = init_torch_params(kp, INPUT_DIM)
    w_eff, bias = fold_params(torch_params)

    # Small single-tile case (grid = 1).
    x = jax.random.normal(kx, (B, INPUT_DIM), jnp.float32)
    out = jax.block_until_ready(regression_forward(x, w_eff, bias))
    ref = reference_forward(x, torch_params)
    assert out.shape == (B, 1), out.shape
    np.testing.assert_allclose(np.asarray(out), np.asarray(ref),
                               rtol=1e-4, atol=1e-4)

    # Multi-tile + ragged-last-tile path (grid = 5, no wrapper padding).
    B2 = 37
    x2 = jax.random.normal(kx2, (B2, INPUT_DIM), jnp.float32)
    out2 = jax.block_until_ready(regression_forward(x2, w_eff, bias, tile_rows=8))
    ref2 = reference_forward(x2, torch_params)
    assert out2.shape == (B2, 1), out2.shape
    np.testing.assert_allclose(np.asarray(out2), np.asarray(ref2),
                               rtol=1e-4, atol=1e-4)

    print("KERNEL_OK")
</pallas_src>

<mosaic_0001>
module attributes {stable_mosaic.version = 11 : i64} {
  func.func @matvec_kernel(%arg0: i32, %arg1: memref<8x32xf32, #tpu.memory_space<vmem>>, %arg2: memref<1x32xf32, #tpu.memory_space<vmem>>, %arg3: memref<1x1xf32, #tpu.memory_space<smem>>, %arg4: memref<8x1xf32, #tpu.memory_space<vmem>>) attributes {dimension_semantics = [#tpu.dimension_semantics<parallel>], iteration_bounds = array<i64: 1>, scalar_prefetch = 0 : i64, scratch_operands = 0 : i64, tpu.core_type = #tpu.core_type<tc>, window_params = [{transform_indices = @transform_0, window_bounds = array<i64: 8, 32>}, {pipeline_mode = #tpu.pipeline_mode<synchronous>, transform_indices = @transform_1, window_bounds = array<i64: 1, 32>}, {transform_indices = @transform_2, window_bounds = array<i64: 1, 1>}, {transform_indices = @transform_3, window_bounds = array<i64: 8, 1>}]} {
    %c0 = arith.constant 0 : index
    %c0_0 = arith.constant 0 : index
    %0 = vector.load %arg1[%c0, %c0_0] : memref<8x32xf32, #tpu.memory_space<vmem>>, vector<8x32xf32>
    %c0_1 = arith.constant 0 : index
    %c0_2 = arith.constant 0 : index
    %1 = vector.load %arg2[%c0_1, %c0_2] : memref<1x32xf32, #tpu.memory_space<vmem>>, vector<1x32xf32>
    %2 = vector.broadcast %1 : vector<1x32xf32> to vector<8x32xf32>
    %3 = arith.mulf %0, %2 : vector<8x32xf32>
    %cst = arith.constant dense<0.000000e+00> : vector<8xf32>
    %4 = vector.multi_reduction <add>, %3, %cst [1] : vector<8x32xf32> to vector<8xf32>
    %5 = vector.shape_cast %4 : vector<8xf32> to vector<8x1xf32>
    %c0_3 = arith.constant 0 : index
    %c0_4 = arith.constant 0 : index
    %6 = memref.load %arg3[%c0_3, %c0_4] : memref<1x1xf32, #tpu.memory_space<smem>>
    %7 = vector.broadcast %6 : f32 to vector<8x1xf32>
    %8 = arith.addf %5, %7 : vector<8x1xf32>
    %c0_5 = arith.constant 0 : index
    %c0_6 = arith.constant 0 : index
    %9 = vector.load %arg4[%c0_5, %c0_6] : memref<8x1xf32, #tpu.memory_space<vmem>>, vector<8x1xf32>
    tpu.vector_store %arg4[%c0_5, %c0_6], %8 {strides = array<i32>} : memref<8x1xf32, #tpu.memory_space<vmem>>, vector<8x1xf32>,
    return
  }
  func.func @transform_0(%arg0: i32) -> (i32, i32) {
    %c0_i32 = arith.constant 0 : i32
    %c0_i32_0 = arith.constant 0 : i32
    return %arg0, %c0_i32 : i32, i32
  }
  func.func @transform_1(%arg0: i32) -> (i32, i32) {
    %c0_i32 = arith.constant 0 : i32
    %c0_i32_0 = arith.constant 0 : i32
    %c0_i32_1 = arith.constant 0 : i32
    return %c0_i32, %c0_i32_0 : i32, i32
  }
  func.func @transform_2(%arg0: i32) -> (i32, i32) {
    %c0_i32 = arith.constant 0 : i32
    %c0_i32_0 = arith.constant 0 : i32
    %c0_i32_1 = arith.constant 0 : i32
    return %c0_i32, %c0_i32_0 : i32, i32
  }
  func.func @transform_3(%arg0: i32) -> (i32, i32) {
    %c0_i32 = arith.constant 0 : i32
    %c0_i32_0 = arith.constant 0 : i32
    return %arg0, %c0_i32 : i32, i32
  }
}

</mosaic_0001>

<bundles_post_ra>
// kernel: regression_forward.1
= control target key start
LH: loop header
LB: loop body
LE: loop exit
PB: predicated region body
PF: predicated region fallthrough
CT: control target
= control target key end

     0   :  { %9 = vsyncpa [#allocation4], 0  ;;  %s74_s12 = smov [#allocation3]   ;;  %s107_s0 = inlined_call_operand.hbm [shape: f32[8,32], index: 0, kind: input, shape index: {}]   ;;  %s108_s1 = inlined_call_operand.vmem [shape: f32[1,32], index: 1, kind: input, shape index: {}]   ;;  %s109_s2 = inlined_call_operand.<no memory space> [shape: f32[1,1], index: 2, kind: input, shape index: {}]   ;;  %s110_s3 = inlined_call_operand.vmem [shape: f32[8,1], index: 3, kind: output, shape index: {}]  }
   0x1   :  { %s16_s13 = sshll.u32 %s74_s12, 4  ;;  %s17_s13 = int_to_ptr.vmem [resolvable:$true] %s16_s13 }
   0x2   :  { %s60_s14 = scalar_lea.vmem %s17_s13, 128  ;;  %p65_p1 = scmp.lt.s32.totalorder %s17_s13, %s17_s13 }
   0x3   :  { %p61_p0 = scmp.ne.s32.totalorder %s17_s13, %s60_s14  ;;  %p66_p2 = scmp.lt.s32.totalorder %s60_s14, %s60_s14 }
   0x5   :  { %p67_p3 = por %p66_p2, %p65_p1 }
   0x7   :  { %p68_p4 = pnand %p67_p3, %p61_p0 }
   0x9   :  { %71 = shalt.err (!%p68_p4)
}
   0xa   :  { %19 = dma.hbm_to_vmem [thread:$0]  %s107_s0, 128, %s17_s13, [#allocation4]  }
   0xb   :  { %72 = dma.done.wait [#allocation4], 128  }
   0xc   :  { %73 = vsyncadd [#allocation4], 4294967168  ;;  %v27_v0 = vld [vmem:[#allocation3] sm:$0xff]  ;;  %vm36_vm0 = vcmask 261120   ;;  %v41_v4 = vstv %s109_s2  ;;  %vm43_vm1 = vcmask 7168  }
   0xd   :  { %v50_v1 = vld [vmem:[%s108_s1] ss:$0 sm:$0xff] }
   0xe   :  { %v35_v2 = vmul.f32 %v50_v1, %v27_v0 }
  0x10   :  { %v37_v3 = vsel %vm36_vm0, %v35_v2, 0.0 }
  0x11   :  { %38 = vadd.xlane.f32.xlu0 %v37_v3 }
  0x9a   :  { %v39_v5 = vpop.xlane.xlu0 %38 }
  0x9b   :  { %v42_v6 = vadd.f32 %v41_v4, %v39_v5 }
  0x9d   :  { %44 = vst.msk [vmem:[%s110_s3] sm:$0xff] %vm43_vm1, %v42_v6 }
  0x9e   :  { %49 = vsyncpa [#allocation4], 1 }

</bundles_post_ra>
